<compile_context>
chip_gen: v6e
topology: v6e:2x2x1
jax: 0.10.0
libtpu: 0.0.40
codegen_flags: <defaults>
</compile_context>

<pallas_src>
import functools

import jax
import jax.numpy as jnp
from jax.experimental import pallas as pl
from jax.experimental.pallas import tpu as pltpu

_VMEM = pl.BlockSpec(memory_space=pltpu.MemorySpace.VMEM)
_SMEM = pl.BlockSpec(memory_space=pltpu.MemorySpace.SMEM)


# ----------------------------- fused kernel ---------------------------------


def _tco_step_kernel(lr_ref, x_ref, w_ref, b_ref, bufw_ref, bufb_ref,
                     keepw_ref, keepb_ref,
                     new_w_ref, new_b_ref, new_bufw_ref, new_bufb_ref,
                     *, s_l, weight_decay, momentum):
    x = x_ref[...]                  # (N, F)
    w = w_ref[...]                  # (F, C)
    b = b_ref[...]                  # (1, C)

    # ---- net forward (MXU, canonical (N,F)@(F,C) contraction) ---------------
    logits = jnp.dot(x, w, preferred_element_type=jnp.float32) + b   # (N, C)
    c = logits.shape[1]

    # ---- softmax (shared by select and CE gradient) --------------------------
    m = jnp.max(logits, axis=1, keepdims=True)
    e = jnp.exp(logits - m)
    s = jnp.sum(e, axis=1, keepdims=True)
    # NOTE: plain divide (not pl.reciprocal) so the kernel also runs under the CPU
    # interpret harness; on TPU the compiler maps the divide off the VALU anyway.
    probs = e / s                                                     # (N, C)

    # ---- Tco.select: rows whose max softmax prob is strictly > s_l ----------
    maxp = jnp.max(probs, axis=1, keepdims=True)                      # (N, 1)
    row_mask = (maxp > s_l).astype(jnp.float32)                       # (N, 1)
    cnt = jnp.sum(row_mask, axis=0, keepdims=True)                    # (1, 1)

    # ---- pseudo-label = first argmax of logits (torch.max tie-break) --------
    col = jax.lax.broadcasted_iota(jnp.int32, logits.shape, 1)
    pred = jnp.min(jnp.where(logits == m, col, c), axis=1, keepdims=True)
    onehot = (col == pred).astype(jnp.float32)                        # (N, C)

    # ---- dLoss/dlogits of mean CE over the selected rows (0 elsewhere) ------
    inv_cnt = 1.0 / jnp.maximum(cnt, 1.0)                             # (1, 1)
    glog = (probs - onehot) * (row_mask * inv_cnt)                    # (N, C)

    # ---- parameter grads (unselected rows contribute 0) ----------------------
    gw = jax.lax.dot_general(x, glog, (((0,), (0,)), ((), ())),
                             preferred_element_type=jnp.float32)      # (F, C)
    gb = jnp.sum(glog, axis=0, keepdims=True)                         # (1, C)

    # ---- doubleSGD.step(drop_p): Dropout(grad)*(1-p) == Bernoulli keep mask
    #      (keep prob 1-p, no rescale); then SGD with weight decay + momentum
    #      (dampening=0, nesterov=False, maximize=False). Zero-initialized
    #      momentum buffers make the general formula cover the first step too.
    lr = lr_ref[0]
    bufw = bufw_ref[...]
    bufb = bufb_ref[...]
    d_pw = gw * keepw_ref[...] + weight_decay * w
    d_pb = gb * keepb_ref[...] + weight_decay * b
    bufw_new = momentum * bufw + d_pw
    bufb_new = momentum * bufb + d_pb

    # ---- gate the whole update on "er": at least 2 selected rows ------------
    gate = (cnt >= 2.0).astype(jnp.float32)                           # (1, 1)
    new_bufw_ref[...] = bufw + gate * (bufw_new - bufw)
    new_bufb_ref[...] = bufb + gate * (bufb_new - bufb)
    new_w_ref[...] = w - (gate * lr) * bufw_new
    new_b_ref[...] = b - (gate * lr) * bufb_new


# ----------------------------- jitted step wrapper ---------------------------


def _build_step(drop_p, s_l, weight_decay, momentum):
    kern = functools.partial(_tco_step_kernel, s_l=s_l,
                             weight_decay=weight_decay, momentum=momentum)
    keep_p = 1.0 - drop_p

    def step(x_flat, w, b, buf_w, buf_b, lr, key, step_idx):
        # Dropout keep masks drawn outside the kernel (portable; no TPU-only PRNG).
        # TODO(synk): this is JAX's threefry stream, not torch's RNG stream.
        k = jax.random.fold_in(key, step_idx)
        kw, kb = jax.random.split(k)
        keep_w = jax.random.bernoulli(kw, keep_p, w.shape).astype(jnp.float32)
        keep_b = jax.random.bernoulli(kb, keep_p, b.shape).astype(jnp.float32)
        lr_arr = jnp.reshape(jnp.asarray(lr, jnp.float32), (1,))

        # TODO(synk): for realistic image sizes (F ~ 1e4-1e5) add a grid over the F
        # axis (marked "parallel" for v7x's two TensorCores) and set vmem_limit_bytes;
        # at these demo shapes whole-array VMEM blocks fit trivially.
        return pl.pallas_call(
            kern,
            out_shape=(jax.ShapeDtypeStruct(w.shape, jnp.float32),      # new W
                       jax.ShapeDtypeStruct(b.shape, jnp.float32),      # new b
                       jax.ShapeDtypeStruct(w.shape, jnp.float32),      # new buf_W
                       jax.ShapeDtypeStruct(b.shape, jnp.float32)),     # new buf_b
            in_specs=[_SMEM, _VMEM, _VMEM, _VMEM, _VMEM, _VMEM, _VMEM, _VMEM],
            out_specs=(_VMEM, _VMEM, _VMEM, _VMEM),
            # In-place param / momentum-buffer update (P8):
            # w -> new_w, b -> new_b, buf_w -> new_buf_w, buf_b -> new_buf_b.
            input_output_aliases={2: 0, 3: 1, 4: 2, 5: 3},
        )(lr_arr, x_flat, w, b, buf_w, buf_b, keep_w, keep_b)

    return jax.jit(step)


# ----------------------------- Tco (JAX / Pallas) ----------------------------


class TcoPallas:
    """JAX/Pallas port of Tco.forward for a deterministic synthetic linear net."""

    def __init__(self, drop_p=0.8, s_l=0.7, gamma=0.1, steps=22,
                 lr=1e-4, weight_decay=1e-4, momentum=0.9, seed=0):
        self.drop_p = drop_p
        self.s_l = s_l
        self.gamma = gamma
        self.steps = steps
        self.lr = lr
        self._epoch = 0
        self._step_idx = 0
        self._key = jax.random.PRNGKey(seed)
        self._step = _build_step(drop_p, s_l, weight_decay, momentum)

    def forward(self, validate_batches, w, b, buf_w, buf_b):
        # TODO(synk): tqdm progress bar / DataLoader iteration is host-side only.
        for imgs in validate_batches:                 # imgs: (N, C, H, W) NCHW
            x_flat = imgs.reshape(imgs.shape[0], -1)
            w, b, buf_w, buf_b = self._step(
                x_flat, w, b, buf_w, buf_b,
                jnp.float32(self.lr), self._key, jnp.int32(self._step_idx))
            self._step_idx += 1
        # StepLR(step_size=steps, gamma): host-side scalar schedule.
        self._epoch += 1
        if self._epoch % self.steps == 0:
            self.lr *= self.gamma
        return w, b, buf_w, buf_b


# ----------------------------- demo ------------------------------------------

if __name__ == "__main__":
    key = jax.random.PRNGKey(0)
    N, C_in, H, W_sp = 8, 4, 8, 8                 # small NCHW batch
    NUM_CLASSES = 8
    FEAT = C_in * H * W_sp                        # 256

    k1, k2, k3 = jax.random.split(key, 3)
    # deterministic synthetic "net" parameters, feature-major W (F, C); the scale
    # makes the softmax confident so the s_l = 0.7 selection threshold is exercised.
    w = jax.random.normal(k1, (FEAT, NUM_CLASSES), jnp.float32) * 0.5
    b = jnp.zeros((1, NUM_CLASSES), jnp.float32)
    buf_w = jnp.zeros_like(w)
    buf_b = jnp.zeros_like(b)

    # synthetic "validate_loader": two batches
    batches = [jax.random.normal(k2, (N, C_in, H, W_sp), jnp.float32),
               jax.random.normal(k3, (N, C_in, H, W_sp), jnp.float32)]

    tco = TcoPallas(drop_p=0.8, s_l=0.7, gamma=0.1, steps=22,
                    lr=1e-4, weight_decay=1e-4, momentum=0.9, seed=0)
    w, b, buf_w, buf_b = tco.forward(batches, w, b, buf_w, buf_b)
    jax.block_until_ready((w, b, buf_w, buf_b))
    print("KERNEL_OK")
</pallas_src>

<mosaic_0001>
module attributes {stable_mosaic.version = 11 : i64} {
  func.func @_tco_step_kernel(%arg0: memref<1xf32, #tpu.memory_space<smem>>, %arg1: memref<8x256xf32, #tpu.memory_space<vmem>>, %arg2: memref<256x8xf32, #tpu.memory_space<vmem>>, %arg3: memref<1x8xf32, #tpu.memory_space<vmem>>, %arg4: memref<256x8xf32, #tpu.memory_space<vmem>>, %arg5: memref<1x8xf32, #tpu.memory_space<vmem>>, %arg6: memref<256x8xf32, #tpu.memory_space<vmem>>, %arg7: memref<1x8xf32, #tpu.memory_space<vmem>>, %arg8: memref<256x8xf32, #tpu.memory_space<vmem>>, %arg9: memref<1x8xf32, #tpu.memory_space<vmem>>, %arg10: memref<256x8xf32, #tpu.memory_space<vmem>>, %arg11: memref<1x8xf32, #tpu.memory_space<vmem>>) attributes {dimension_semantics = [], scalar_prefetch = 0 : i64, scratch_operands = 0 : i64, tpu.core_type = #tpu.core_type<tc>} {
    %c0 = arith.constant 0 : index
    %c0_0 = arith.constant 0 : index
    %0 = vector.load %arg1[%c0, %c0_0] : memref<8x256xf32, #tpu.memory_space<vmem>>, vector<8x256xf32>
    %c0_1 = arith.constant 0 : index
    %c0_2 = arith.constant 0 : index
    %1 = vector.load %arg2[%c0_1, %c0_2] : memref<256x8xf32, #tpu.memory_space<vmem>>, vector<256x8xf32>
    %c0_3 = arith.constant 0 : index
    %c0_4 = arith.constant 0 : index
    %2 = vector.load %arg3[%c0_3, %c0_4] : memref<1x8xf32, #tpu.memory_space<vmem>>, vector<1x8xf32>
    %cst = arith.constant dense<0.000000e+00> : vector<8x8xf32>
    %3 = tpu.matmul %0, %1, %cst {dimension_numbers = #tpu.dot_dimension_numbers<[1], [0], [0], [1], [0, 0, 1, 1], [], []>} : vector<8x256xf32>, vector<256x8xf32>, vector<8x8xf32> -> vector<8x8xf32>
    %4 = vector.broadcast %2 : vector<1x8xf32> to vector<8x8xf32>
    %5 = arith.addf %3, %4 : vector<8x8xf32>
    %cst_5 = arith.constant dense<0xFF800000> : vector<8xf32>
    %6 = vector.multi_reduction <maximumf>, %5, %cst_5 [1] : vector<8x8xf32> to vector<8xf32>
    %7 = vector.shape_cast %6 : vector<8xf32> to vector<8x1xf32>
    %8 = vector.broadcast %7 : vector<8x1xf32> to vector<8x8xf32>
    %9 = arith.subf %5, %8 : vector<8x8xf32>
    %10 = math.exp %9 : vector<8x8xf32>
    %cst_6 = arith.constant dense<0.000000e+00> : vector<8xf32>
    %11 = vector.multi_reduction <add>, %10, %cst_6 [1] : vector<8x8xf32> to vector<8xf32>
    %12 = vector.shape_cast %11 : vector<8xf32> to vector<8x1xf32>
    %13 = vector.broadcast %12 : vector<8x1xf32> to vector<8x8xf32>
    %14 = arith.divf %10, %13 : vector<8x8xf32>
    %cst_7 = arith.constant dense<0xFF800000> : vector<8xf32>
    %15 = vector.multi_reduction <maximumf>, %14, %cst_7 [1] : vector<8x8xf32> to vector<8xf32>
    %16 = vector.shape_cast %15 : vector<8xf32> to vector<8x1xf32>
    %cst_8 = arith.constant 0.699999988 : f32
    %17 = vector.broadcast %cst_8 : f32 to vector<8x1xf32>
    %18 = arith.cmpf ogt, %16, %17 : vector<8x1xf32>
    %19 = arith.extui %18 : vector<8x1xi1> to vector<8x1xi32>
    %20 = arith.sitofp %19 : vector<8x1xi32> to vector<8x1xf32>
    %cst_9 = arith.constant dense<0.000000e+00> : vector<1xf32>
    %21 = vector.multi_reduction <add>, %20, %cst_9 [0] : vector<8x1xf32> to vector<1xf32>
    %22 = vector.shape_cast %21 : vector<1xf32> to vector<1x1xf32>
    %23 = tpu.iota {dimensions = array<i32: 1>} : vector<8x8xi32>
    %24 = vector.broadcast %7 : vector<8x1xf32> to vector<8x8xf32>
    %25 = arith.cmpf oeq, %5, %24 : vector<8x8xf32>
    %c8_i32 = arith.constant 8 : i32
    %26 = vector.broadcast %c8_i32 : i32 to vector<8x8xi32>
    %27 = arith.select %25, %23, %26 : vector<8x8xi1>, vector<8x8xi32>
    %cst_10 = arith.constant dense<2147483647> : vector<8xi32>
    %28 = vector.multi_reduction <minsi>, %27, %cst_10 [1] : vector<8x8xi32> to vector<8xi32>
    %29 = vector.shape_cast %28 : vector<8xi32> to vector<8x1xi32>
    %30 = vector.broadcast %29 : vector<8x1xi32> to vector<8x8xi32>
    %31 = arith.cmpi eq, %23, %30 : vector<8x8xi32>
    %32 = arith.extui %31 : vector<8x8xi1> to vector<8x8xi32>
    %33 = arith.sitofp %32 : vector<8x8xi32> to vector<8x8xf32>
    %cst_11 = arith.constant 1.000000e+00 : f32
    %34 = vector.broadcast %cst_11 : f32 to vector<1x1xf32>
    %35 = arith.maximumf %22, %34 : vector<1x1xf32>
    %cst_12 = arith.constant 1.000000e+00 : f32
    %36 = vector.broadcast %cst_12 : f32 to vector<1x1xf32>
    %37 = arith.divf %36, %35 : vector<1x1xf32>
    %38 = arith.subf %14, %33 : vector<8x8xf32>
    %39 = vector.broadcast %37 : vector<1x1xf32> to vector<8x1xf32>
    %40 = arith.mulf %20, %39 : vector<8x1xf32>
    %41 = vector.broadcast %40 : vector<8x1xf32> to vector<8x8xf32>
    %42 = arith.mulf %38, %41 : vector<8x8xf32>
    %cst_13 = arith.constant dense<0.000000e+00> : vector<256x8xf32>
    %43 = tpu.matmul %0, %42, %cst_13 {dimension_numbers = #tpu.dot_dimension_numbers<[0], [0], [1], [1], [0, 1, 1, 1], [], []>} : vector<8x256xf32>, vector<8x8xf32>, vector<256x8xf32> -> vector<256x8xf32>
    %cst_14 = arith.constant dense<0.000000e+00> : vector<8xf32>
    %44 = vector.multi_reduction <add>, %42, %cst_14 [0] : vector<8x8xf32> to vector<8xf32>
    %45 = vector.shape_cast %44 : vector<8xf32> to vector<1x8xf32>
    %c0_15 = arith.constant 0 : index
    %46 = memref.load %arg0[%c0_15] : memref<1xf32, #tpu.memory_space<smem>>
    %c0_16 = arith.constant 0 : index
    %c0_17 = arith.constant 0 : index
    %47 = vector.load %arg4[%c0_16, %c0_17] : memref<256x8xf32, #tpu.memory_space<vmem>>, vector<256x8xf32>
    %c0_18 = arith.constant 0 : index
    %c0_19 = arith.constant 0 : index
    %48 = vector.load %arg5[%c0_18, %c0_19] : memref<1x8xf32, #tpu.memory_space<vmem>>, vector<1x8xf32>
    %c0_20 = arith.constant 0 : index
    %c0_21 = arith.constant 0 : index
    %49 = vector.load %arg6[%c0_20, %c0_21] : memref<256x8xf32, #tpu.memory_space<vmem>>, vector<256x8xf32>
    %50 = arith.mulf %43, %49 : vector<256x8xf32>
    %cst_22 = arith.constant 9.99999974E-5 : f32
    %51 = vector.broadcast %cst_22 : f32 to vector<256x8xf32>
    %52 = arith.mulf %51, %1 : vector<256x8xf32>
    %53 = arith.addf %50, %52 : vector<256x8xf32>
    %c0_23 = arith.constant 0 : index
    %c0_24 = arith.constant 0 : index
    %54 = vector.load %arg7[%c0_23, %c0_24] : memref<1x8xf32, #tpu.memory_space<vmem>>, vector<1x8xf32>
    %55 = arith.mulf %45, %54 : vector<1x8xf32>
    %cst_25 = arith.constant 9.99999974E-5 : f32
    %56 = vector.broadcast %cst_25 : f32 to vector<1x8xf32>
    %57 = arith.mulf %56, %2 : vector<1x8xf32>
    %58 = arith.addf %55, %57 : vector<1x8xf32>
    %cst_26 = arith.constant 0.899999976 : f32
    %59 = vector.broadcast %cst_26 : f32 to vector<256x8xf32>
    %60 = arith.mulf %59, %47 : vector<256x8xf32>
    %61 = arith.addf %60, %53 : vector<256x8xf32>
    %cst_27 = arith.constant 0.899999976 : f32
    %62 = vector.broadcast %cst_27 : f32 to vector<1x8xf32>
    %63 = arith.mulf %62, %48 : vector<1x8xf32>
    %64 = arith.addf %63, %58 : vector<1x8xf32>
    %cst_28 = arith.constant 2.000000e+00 : f32
    %65 = vector.broadcast %cst_28 : f32 to vector<1x1xf32>
    %66 = arith.cmpf oge, %22, %65 : vector<1x1xf32>
    %67 = arith.extui %66 : vector<1x1xi1> to vector<1x1xi32>
    %68 = arith.sitofp %67 : vector<1x1xi32> to vector<1x1xf32>
    %69 = arith.subf %61, %47 : vector<256x8xf32>
    %70 = vector.broadcast %68 : vector<1x1xf32> to vector<256x8xf32>
    %71 = arith.mulf %70, %69 : vector<256x8xf32>
    %72 = arith.addf %47, %71 : vector<256x8xf32>
    %c0_29 = arith.constant 0 : index
    %c0_30 = arith.constant 0 : index
    %73 = vector.load %arg10[%c0_29, %c0_30] : memref<256x8xf32, #tpu.memory_space<vmem>>, vector<256x8xf32>
    tpu.vector_store %arg10[%c0_29, %c0_30], %72 {strides = array<i32>} : memref<256x8xf32, #tpu.memory_space<vmem>>, vector<256x8xf32>,
    %74 = arith.subf %64, %48 : vector<1x8xf32>
    %75 = vector.broadcast %68 : vector<1x1xf32> to vector<1x8xf32>
    %76 = arith.mulf %75, %74 : vector<1x8xf32>
    %77 = arith.addf %48, %76 : vector<1x8xf32>
    %c0_31 = arith.constant 0 : index
    %c0_32 = arith.constant 0 : index
    %78 = vector.load %arg11[%c0_31, %c0_32] : memref<1x8xf32, #tpu.memory_space<vmem>>, vector<1x8xf32>
    tpu.vector_store %arg11[%c0_31, %c0_32], %77 {strides = array<i32>} : memref<1x8xf32, #tpu.memory_space<vmem>>, vector<1x8xf32>,
    %79 = vector.broadcast %46 : f32 to vector<1x1xf32>
    %80 = arith.mulf %68, %79 : vector<1x1xf32>
    %81 = vector.broadcast %80 : vector<1x1xf32> to vector<256x8xf32>
    %82 = arith.mulf %81, %61 : vector<256x8xf32>
    %83 = arith.subf %1, %82 : vector<256x8xf32>
    %c0_33 = arith.constant 0 : index
    %c0_34 = arith.constant 0 : index
    %84 = vector.load %arg8[%c0_33, %c0_34] : memref<256x8xf32, #tpu.memory_space<vmem>>, vector<256x8xf32>
    tpu.vector_store %arg8[%c0_33, %c0_34], %83 {strides = array<i32>} : memref<256x8xf32, #tpu.memory_space<vmem>>, vector<256x8xf32>,
    %85 = vector.broadcast %46 : f32 to vector<1x1xf32>
    %86 = arith.mulf %68, %85 : vector<1x1xf32>
    %87 = vector.broadcast %86 : vector<1x1xf32> to vector<1x8xf32>
    %88 = arith.mulf %87, %64 : vector<1x8xf32>
    %89 = arith.subf %2, %88 : vector<1x8xf32>
    %c0_35 = arith.constant 0 : index
    %c0_36 = arith.constant 0 : index
    %90 = vector.load %arg9[%c0_35, %c0_36] : memref<1x8xf32, #tpu.memory_space<vmem>>, vector<1x8xf32>
    tpu.vector_store %arg9[%c0_35, %c0_36], %89 {strides = array<i32>} : memref<1x8xf32, #tpu.memory_space<vmem>>, vector<1x8xf32>,
    return
  }
}

</mosaic_0001>

<bundles_post_ra>
// kernel: step.1
= control target key start
LH: loop header
LB: loop body
LE: loop exit
PB: predicated region body
PF: predicated region fallthrough
CT: control target
= control target key end

     0   :  { %v70_v34 = vlaneseq  ;;  %vm145_vm0 = vcmask 64512   ;;  %v1252_v63 = vmov 0.0   ;;  %vm955_vm6 = vcmask 57344   ;;  %s2400_s2 = inlined_call_operand.vmem [shape: f32[256,8], index: 2, kind: input, shape index: {}, may-alias: {2,8}]   ;;  %s2401_s1 = inlined_call_operand.vmem [shape: f32[8,256], index: 1, kind: input, shape index: {}]   ;;  %s2402_s3 = inlined_call_operand.vmem [shape: f32[1,8], index: 3, kind: input, shape index: {}, may-alias: {3,9}]   ;;  %s2403_s5 = inlined_call_operand.vmem [shape: f32[1,8], index: 5, kind: input, shape index: {}, may-alias: {5,11}]   ;;  %s2404_s7 = inlined_call_operand.vmem [shape: f32[1,8], index: 7, kind: input, shape index: {}]   ;;  %s2405_s0 = inlined_call_operand.<no memory space> [shape: f32[1], index: 0, kind: input, shape index: {}]   ;;  %s2406_s9 = inlined_call_operand.vmem [shape: f32[1,8], index: 9, kind: output, shape index: {1}, may-alias: {3,9}]   ;;  %s2407_s11 = inlined_call_operand.vmem [shape: f32[1,8], index: 11, kind: output, shape index: {3}, may-alias: {5,11}]   ;;  %s2408_s4 = inlined_call_operand.vmem [shape: f32[256,8], index: 4, kind: input, shape index: {}, may-alias: {4,10}]   ;;  %s2409_s6 = inlined_call_operand.vmem [shape: f32[256,8], index: 6, kind: input, shape index: {}]   ;;  %s2410_s8 = inlined_call_operand.vmem [shape: f32[256,8], index: 8, kind: output, shape index: {0}, may-alias: {2,8}]   ;;  %s2411_s10 = inlined_call_operand.vmem [shape: f32[256,8], index: 10, kind: output, shape index: {2}, may-alias: {4,10}]  }
   0x1   :  { %v67_v0 = vld [vmem:[%s2400_s2 + $0xf8] sm:$0xff]  ;;  %v66_v2 = vld [vmem:[%s2400_s2 + $0xf0] sm:$0xff]  ;;  %v1333_v4 = vld [vmem:[%s2400_s2 + $0xe8] sm:$0xff] }
   0x2   :  { %v1319_v1 = vld [vmem:[%s2400_s2 + $0x78] sm:$0xff]  ;;  %1109 = vmatprep.subr.mxu0 %v67_v0  ;;  %v1327_v3 = vld [vmem:[%s2400_s2 + $0x70] sm:$0xff]  ;;  %v1338_v5 = vld [vmem:[%s2400_s2 + $0x68] sm:$0xff]  ;;  %v71_v35 = vshrl.u32 %v70_v34, 7  ;;  %v170_v44 = vand.u32 127, %v70_v34 }
   0x3   :  { %1110 = vmatpush3.msra.mxu0 %v1319_v1  ;;  %v64_v6 = vld [vmem:[%s2400_s2 + $0xe0] sm:$0xff]  ;;  %v1354_v8 = vld [vmem:[%s2400_s2 + $0xd8] sm:$0xff]  ;;  %v1365_v10 = vld [vmem:[%s2400_s2 + $0xd0] sm:$0xff] }
   0x4   :  { %1111 = vmatprep.subr.mxu0 %v66_v2  ;;  %v1348_v7 = vld [vmem:[%s2400_s2 + $0x60] sm:$0xff]  ;;  %v1359_v9 = vld [vmem:[%s2400_s2 + $0x58] sm:$0xff]  ;;  %v1371_v11 = vld [vmem:[%s2400_s2 + $0x50] sm:$0xff]  ;;  %v72_v36 = vsub.s32 0, %v71_v35 }
   0x5   :  { %1112 = vmatpush3.msra.mxu0 %v1327_v3  ;;  %v1377_v12 = vld [vmem:[%s2400_s2 + $0xc8] sm:$0xff]  ;;  %v1395_v15 = vld [vmem:[%s2400_s2 + $0xc0] sm:$0xff]  ;;  %v1407_v17 = vld [vmem:[%s2400_s2 + $0xb8] sm:$0xff] }
   0x6   :  { %1113 = vmatprep.subr.mxu0 %v1333_v4  ;;  %v1382_v13 = vld [vmem:[%s2401_s1 + $0x8] sm:$0xff]  ;;  %v1401_v16 = vld [vmem:[%s2400_s2 + $0x40] sm:$0xff]  ;;  %v1413_v18 = vld [vmem:[%s2400_s2 + $0x38] sm:$0xff] }
   0x7   :  { %1114 = vmatpush3.msra.mxu0 %v1338_v5  ;;  %v1388_v14 = vld [vmem:[%s2400_s2 + $0x48] sm:$0xff]  ;;  %139 = vmatprep.mubr.f32.mxu0 %v1382_v13  ;;  %v1419_v19 = vld [vmem:[%s2400_s2 + $0xb0] sm:$0xff]  ;;  %v1443_v23 = vld [vmem:[%s2400_s2 + $0xa0] sm:$0xff] }
   0x8   :  { %1115 = vmatprep.subr.mxu0 %v64_v6  ;;  %v1425_v20 = vld [vmem:[%s2400_s2 + $0x30] sm:$0xff]  ;;  %v1431_v21 = vld [vmem:[%s2400_s2 + $0xa8] sm:$0xff]  ;;  %v1449_v24 = vld [vmem:[%s2400_s2 + $0x20] sm:$0xff] }
   0x9   :  { %1116 = vmatpush3.msra.mxu0 %v1348_v7  ;;  %v1437_v22 = vld [vmem:[%s2400_s2 + $0x28] sm:$0xff]  ;;  %v1455_v25 = vld [vmem:[%s2400_s2 + $0x98] sm:$0xff]  ;;  %v1467_v27 = vld [vmem:[%s2400_s2 + $0x90] sm:$0xff] }
   0xa   :  { %1117 = vmatprep.subr.mxu0 %v1354_v8  ;;  %v1461_v26 = vld [vmem:[%s2400_s2 + $0x18] sm:$0xff]  ;;  %v1473_v28 = vld [vmem:[%s2400_s2 + $0x10] sm:$0xff]  ;;  %v1479_v29 = vld [vmem:[%s2400_s2 + $0x88] sm:$0xff] }
   0xb   :  { %1118 = vmatpush3.msra.mxu0 %v1359_v9  ;;  %v1485_v30 = vld [vmem:[%s2400_s2 + $0x8] sm:$0xff]  ;;  %v1491_v31 = vld [vmem:[%s2400_s2 + $0x80] sm:$0xff] }
   0xc   :  { %1119 = vmatprep.subr.mxu0 %v1365_v10  ;;  %v1497_v32 = vld [vmem:[%s2400_s2] sm:$0xff] }
   0xd   :  { %1120 = vmatpush3.msra.mxu0 %v1371_v11  ;;  %v34_v33 = vld [vmem:[%s2401_s1] sm:$0xff] }
   0xe   :  { %1121 = vmatprep.subr.mxu0 %v1377_v12  ;;  %v1508_v37 = vld [vmem:[%s2402_s3] sm:$0x1] }
   0xf   :  { %1122 = vmatpush3.msra.mxu0 %v1388_v14  ;;  %v73_v39 = vrot.slane %v1508_v37, %v72_v36 }
  0x10   :  { %1123 = vmatprep.subr.mxu0 %v1395_v15 }
  0x11   :  { %1124 = vmatpush3.msra.mxu0 %v1401_v16 }
  0x12   :  { %1125 = vmatprep.subr.mxu0 %v1407_v17 }
  0x13   :  { %1126 = vmatpush3.msra.mxu0 %v1413_v18 }
  0x14   :  { %1127 = vmatprep.subr.mxu0 %v1419_v19 }
  0x15   :  { %1128 = vmatpush3.msra.mxu0 %v1425_v20 }
  0x16   :  { %1129 = vmatprep.subr.mxu0 %v1431_v21 }
  0x17   :  { %1130 = vmatpush3.msra.mxu0 %v1437_v22 }
  0x18   :  { %1131 = vmatprep.subr.mxu0 %v1443_v23 }
  0x19   :  { %1132 = vmatpush3.msra.mxu0 %v1449_v24 }
  0x1a   :  { %1133 = vmatprep.subr.mxu0 %v1455_v25 }
  0x1b   :  { %1134 = vmatpush3.msra.mxu0 %v1461_v26 }
  0x1c   :  { %1135 = vmatprep.subr.mxu0 %v1467_v27 }
  0x1d   :  { %1136 = vmatpush3.msra.mxu0 %v1473_v28 }
  0x1e   :  { %1137 = vmatprep.subr.mxu0 %v1479_v29 }
  0x1f   :  { %1138 = vmatpush3.msra.mxu0 %v1485_v30 }
  0x20   :  { %1139 = vmatprep.subr.mxu0 %v1491_v31 }
  0x21   :  { %1140 = vmatpush3.msra.mxu0 %v1497_v32 }
  0x22   :  { %140 = vmatmul.mubr.f32.vlgmr.msra.gmra.mxu0 %v34_v33 }
  0xe2   :  { %v1141_v38 = vpop.f32.mrf.mxu0 }
  0xe4   :  { %v1142_v40 = vpop.f32.mrf.mxu0 }
  0xe5   :  { %v1143_v41 = vadd.f32 %v1142_v40, %v1141_v38 }
  0xe7   :  { %v142_v42 = vadd.f32 %v1143_v41, %v73_v39 }
  0xe9   :  { %v146_v43 = vsel %vm145_vm0, %v142_v42, -inf }
  0xea   :  { %147 = vmax.xlane.f32.xlu0 %v146_v43 }
 0x173   :  { %v148_v45 = vpop.xlane.xlu0 %147 }
 0x174   :  { %v149_v46 = vsub.f32 %v142_v42, %v148_v45  ;;  %vm171_vm1 = vcmp.eq.f32.partialorder %v142_v42, %v148_v45 }
 0x175   :  { %v172_v47 = vsel %vm171_vm1, %v170_v44, 8 }
 0x176   :  { %v150_v48 = vmul.f32 1.442695, %v149_v46  ;;  %v173_v49 = vsel %vm145_vm0, %v172_v47, 2147483647 }
 0x177   :  { %v175_v50 = vshra.s32 %v173_v49, 16  ;;  %v174_v54 = vand.u32 65535, %v173_v49 }
 0x178   :  { %1230 = vpow2.f32 %v150_v48 }
 0x179   :  { %v177_v51 = vcvt.s32.f32 %v175_v50  ;;  %v176_v56 = vcvt.s32.f32 %v174_v54 }
 0x17b   :  { %178 = vmin.xlane.f32.xlu1 %v177_v51 }
 0x185   :  { %v1231_v52 = vpop.eup %1230 }
 0x186   :  { %v152_v53 = vsel %vm145_vm0, %v1231_v52, 0.0 }
 0x187   :  { %153 = vadd.xlane.f32.xlu0 %v152_v53 }
 0x204   :  { %v179_v55 = vpop.xlane.xlu1 %178 }
 0x205   :  { %vm180_vm2 = vcmp.eq.f32.partialorder %v177_v51, %v179_v55  ;;  %v185_v40 = vcvt.f32.s32 %v179_v55 }
 0x206   :  { %v181_v57 = vsel %vm180_vm2, %v176_v56, inf }
 0x207   :  { %182 = vmin.xlane.f32.xlu0 %v181_v57  ;;  %v186_v43 = vshll.u32 %v185_v40, 16 }
 0x210   :  { %v154_v58 = vpop.xlane.xlu0 %153 }
 0x211   :  { %1232 = vrcp.f32 %v154_v58  ;;  %v622_v58 = vld [vmem:[%s2403_s5] sm:$0x1] }
 0x21e   :  { %v1233_v59 = vpop.eup %1232 }
 0x21f   :  { %v156_v60 = vmul.f32 %v1233_v59, %v1231_v52  ;;  %v751_v59 = vld [vmem:[%s2404_s7] sm:$0x1] }
 0x221   :  { %v157_v61 = vsel %vm145_vm0, %v156_v60, -inf }
 0x222   :  { %158 = vmax.xlane.f32.xlu1 %v157_v61 }
 0x234   :  { %229 = vxpose.xlu0.b32.start.end [1/1] (short) %v1382_v13, 128 }
 0x255   :  { %197 = vxpose.xlu1.b32.start.end [1/1] (short) %v34_v33, 128 }
 0x290   :  { %v183_v39 = vpop.xlane.xlu0 %182 }
 0x291   :  { %v184_v42 = vcvt.f32.s32 %v183_v39 }
 0x293   :  { %v187_v45 = vadd.s32 %v186_v43, %v184_v42 }
 0x295   :  { %vm188_vm4 = vcmp.eq.s32.totalorder %v170_v44, %v187_v45 }
 0x296   :  { %v1075_v13 = vsel %vm188_vm4, 1.0, %v1252_v63 }
 0x297   :  { %v194_v46 = vsub.f32 %v156_v60, %v1075_v13  ;;  %v753_v60 = vmul.f32 0.0001, %v1508_v37 }
 0x2ab   :  { %v159_v62 = vpop.xlane.xlu1 %158 }
 0x2ac   :  { %vm160_vm3 = vcmp.gt.f32.partialorder %v159_v62, 0.7 }
 0x2ad   :  { %v1074_v0 = vsel %vm160_vm3, 1.0, %v1252_v63 }
 0x2ae   :  { %v163_v2 = vrot.slane %v1074_v0, 4 }
 0x2b0   :  { %v164_v6 = vadd.f32 %v1074_v0, %v163_v2  ;;  %v1517_v53 = vpop.trf.xlu0 }
 0x2b2   :  { %v165_v34 = vrot.slane %v164_v6, 2 }
 0x2b4   :  { %v166_v35 = vadd.f32 %v165_v34, %v164_v6  ;;  %v246_v57 = vpop.trf.xlu0  ;;  %v957_v34 = vstv %s2405_s0 }
 0x2b6   :  { %v167_v36 = vrot.slane %v166_v35, 1 }
 0x2b8   :  { %v168_v38 = vadd.f32 %v167_v36, %v166_v35  ;;  %v247_v39 = vpop.trf.xlu0 }
 0x2ba   :  { %v191_v41 = vmax.f32 %v168_v38, 1.0  ;;  %vm821_vm5 = vcmp.ge.f32.partialorder %v168_v38, 2.0 }
 0x2bb   :  { %v1529_v6 = vsel %vm821_vm5, 1.0, %v1252_v63 }
 0x2bc   :  { %1234 = vrcp.f32 %v191_v41  ;;  %v1536_v41 = vmul.f32 %v1529_v6, %v957_v34  ;;  %v248_v13 = vpop.trf.xlu0 }
 0x2c9   :  { %v1235_v33 = vpop.eup %1234 }
 0x2ca   :  { %v195_v47 = vmul.f32 %v1235_v33, %v1074_v0  ;;  %v819_v0 = vmul.f32 0.9, %v622_v58 }
 0x2cc   :  { %v196_v48 = vmul.f32 %v195_v47, %v194_v46 }
 0x2ce   :  { %v582_v49 = vsel %vm145_vm0, %v196_v48, 0.0  ;;  %1177 = vmatprep.subr.mxu0 %v196_v48  ;;  %1227 = vmatprep.subr.mxu1 %v196_v48 }
 0x2cf   :  { %v583_v50 = vrot.slane %v582_v49, 4  ;;  %1178 = vmatpush3.msra.mxu0 %v196_v48  ;;  %1228 = vmatpush3.msra.mxu1 %v196_v48  ;;  %v249_v48 = vpop.trf.xlu0 }
 0x2d1   :  { %v584_v51 = vadd.f32 %v583_v50, %v582_v49  ;;  %v213_v52 = vpop.trf.xlu1 }
 0x2d2   :  { %1179 = vmatprep.mubr.msk.f32.mxu0 %vm145_vm0, %v213_v52 }
 0x2d3   :  { %v585_v54 = vrot.slane %v584_v51, 2 }
 0x2d5   :  { %v586_v44 = vadd.f32 %v585_v54, %v584_v51  ;;  %v214_v55 = vpop.trf.xlu1 }
 0x2d6   :  { %1180 = vmatmul.mubr.msk.f32.vlgmr.msra.gmra.mxu0 %vm145_vm0, %v214_v55 }
 0x2d7   :  { %v587_v56 = vrot.slane %v586_v44, 1 }
 0x2d9   :  { %v588_v61 = vadd.f32 %v587_v56, %v586_v44  ;;  %v215_v62 = vpop.trf.xlu1 }
 0x2da   :  { %1182 = vmatprep.mubr.msk.f32.mxu0 %vm145_vm0, %v215_v62 }
 0x2db   :  { %v752_v2 = vmul.f32 %v751_v59, %v588_v61 }
 0x2dd   :  { %v754_v35 = vadd.f32 %v753_v60, %v752_v2  ;;  %v216_v36 = vpop.trf.xlu1 }
 0x2de   :  { %1183 = vmatmul.mubr.msk.f32.gmra.mxu0 %vm145_vm0, %v216_v36  ;;  %v591_v36 = vld [vmem:[%s2408_s4 + $0x8] sm:$0xff] }
 0x2df   :  { %v820_v40 = vadd.f32 %v819_v0, %v754_v35 }
 0x2e1   :  { %v952_v38 = vsub.f32 %v820_v40, %v622_v58  ;;  %v1055_v42 = vmul.f32 %v1536_v41, %v820_v40  ;;  %v217_v43 = vpop.trf.xlu1  ;;  %v688_v40 = vmul.f32 0.0001, %v1485_v30 }
 0x2e2   :  { %1185 = vmatprep.mubr.msk.f32.mxu0 %vm145_vm0, %v217_v43  ;;  %v623_v43 = vld [vmem:[%s2409_s6] sm:$0xff] }
 0x2e3   :  { %v953_v63 = vmul.f32 %v1529_v6, %v952_v38  ;;  %v1056_v45 = vsub.f32 %v1508_v37, %v1055_v42  ;;  %v250_v37 = vpop.trf.xlu0  ;;  %v590_v42 = vld [vmem:[%s2408_s4] sm:$0xff] }
 0x2e5   :  { %v954_v33 = vadd.f32 %v953_v63, %v622_v58  ;;  %1057 = vst.msk [vmem:[%s2406_s9] sm:$0x1] %vm955_vm6, %v1056_v45  ;;  %v218_v46 = vpop.trf.xlu1  ;;  %v756_v45 = vmul.f32 0.9, %v591_v36 }
 0x2e6   :  { %1186 = vmatmul.mubr.msk.f32.gmra.mxu0 %vm145_vm0, %v218_v46 }
 0x2e7   :  { %956 = vst.msk [vmem:[%s2407_s11] sm:$0x1] %vm955_vm6, %v954_v33  ;;  %v251_v52 = vpop.trf.xlu0 }
 0x2e9   :  { %v219_v47 = vpop.trf.xlu1 }
 0x2ea   :  { %1188 = vmatprep.mubr.msk.f32.mxu1 %vm145_vm0, %v219_v47 }
 0x2eb   :  { %v252_v44 = vpop.trf.xlu0 }
 0x2ed   :  { %v220_v49 = vpop.trf.xlu1 }
 0x2ee   :  { %1189 = vmatmul.mubr.msk.f32.vlgmr.msra.gmra.mxu1 %vm145_vm0, %v220_v49 }
 0x2ef   :  { %v253_v58 = vpop.trf.xlu0 }
 0x2f1   :  { %v221_v50 = vpop.trf.xlu1 }
 0x2f2   :  { %1191 = vmatprep.mubr.msk.f32.mxu1 %vm145_vm0, %v221_v50 }
 0x2f3   :  { %v254_v60 = vpop.trf.xlu0 }
 0x2f5   :  { %v222_v51 = vpop.trf.xlu1 }
 0x2f6   :  { %1192 = vmatmul.mubr.msk.f32.gmra.mxu1 %vm145_vm0, %v222_v51 }
 0x2f7   :  { %v255_v0 = vpop.trf.xlu0 }
 0x2f9   :  { %v223_v54 = vpop.trf.xlu1 }
 0x2fa   :  { %1194 = vmatprep.mubr.msk.f32.mxu1 %vm145_vm0, %v223_v54  ;;  %v593_v54 = vld [vmem:[%s2408_s4 + $0x18] sm:$0xff] }
 0x2fb   :  { %v256_v2 = vpop.trf.xlu0 }
 0x2fd   :  { %v224_v55 = vpop.trf.xlu1 }
 0x2fe   :  { %1195 = vmatmul.mubr.msk.f32.gmra.mxu1 %vm145_vm0, %v224_v55  ;;  %v592_v55 = vld [vmem:[%s2408_s4 + $0x10] sm:$0xff] }
 0x2ff   :  { %v257_v34 = vpop.trf.xlu0 }
 0x301   :  { %v225_v56 = vpop.trf.xlu1 }
 0x302   :  { %1197 = vmatprep.mubr.msk.f32.mxu1 %vm145_vm0, %v225_v56 }
 0x303   :  { %v258_v35 = vpop.trf.xlu0 }
 0x305   :  { %v226_v59 = vpop.trf.xlu1 }
 0x306   :  { %1198 = vmatmul.mubr.msk.f32.gmra.mxu1 %vm145_vm0, %v226_v59  ;;  %v625_v59 = vld [vmem:[%s2409_s6 + $0x10] sm:$0xff] }
 0x309   :  { %v227_v61 = vpop.trf.xlu1 }
 0x30a   :  { %1200 = vmatprep.mubr.msk.f32.mxu1 %vm145_vm0, %v227_v61 }
 0x30d   :  { %v228_v62 = vpop.trf.xlu1 }
 0x30e   :  { %1201 = vmatmul.mubr.msk.f32.gmra.mxu1 %vm145_vm0, %v228_v62 }
 0x30f   :  { %1203 = vmatprep.mubr.msk.f32.mxu1 %vm145_vm0, %v1517_v53  ;;  %v259_v53 = vpop.trf.xlu0 }
 0x312   :  { %1204 = vmatmul.mubr.msk.f32.gmra.mxu1 %vm145_vm0, %v246_v57 }
 0x313   :  { %1206 = vmatprep.mubr.msk.f32.mxu1 %vm145_vm0, %v247_v39  ;;  %v260_v57 = vpop.trf.xlu0  ;;  %v624_v39 = vld [vmem:[%s2409_s6 + $0x8] sm:$0xff] }
 0x316   :  { %1207 = vmatmul.mubr.msk.f32.gmra.mxu1 %vm145_vm0, %v248_v13  ;;  %v687_v13 = vmul.f32 0.0001, %v1497_v32 }
 0x317   :  { %1209 = vmatprep.mubr.msk.f32.mxu1 %vm145_vm0, %v249_v48  ;;  %v755_v48 = vmul.f32 0.9, %v590_v42 }
 0x31a   :  { %1210 = vmatmul.mubr.msk.f32.gmra.mxu1 %vm145_vm0, %v250_v37 }
 0x31b   :  { %1212 = vmatprep.mubr.msk.f32.mxu1 %vm145_vm0, %v251_v52 }
 0x31e   :  { %1213 = vmatmul.mubr.msk.f32.gmra.mxu1 %vm145_vm0, %v252_v44  ;;  %v626_v44 = vld [vmem:[%s2409_s6 + $0x18] sm:$0xff] }
 0x31f   :  { %1215 = vmatprep.mubr.msk.f32.mxu1 %vm145_vm0, %v253_v58  ;;  %v690_v58 = vmul.f32 0.0001, %v1461_v26 }
 0x322   :  { %1216 = vmatmul.mubr.msk.f32.gmra.mxu1 %vm145_vm0, %v254_v60  ;;  %v689_v60 = vmul.f32 0.0001, %v1473_v28 }
 0x323   :  { %1218 = vmatprep.mubr.msk.f32.mxu1 %vm145_vm0, %v255_v0 }
 0x326   :  { %1219 = vmatmul.mubr.msk.f32.gmra.mxu1 %vm145_vm0, %v256_v2 }
 0x327   :  { %1221 = vmatprep.mubr.msk.f32.mxu1 %vm145_vm0, %v257_v34 }
 0x32a   :  { %1222 = vmatmul.mubr.msk.f32.gmra.mxu1 %vm145_vm0, %v258_v35  ;;  %v758_v35 = vmul.f32 0.9, %v593_v54 }
 0x32b   :  { %1224 = vmatprep.mubr.msk.f32.mxu1 %vm145_vm0, %v259_v53 }
 0x32e   :  { %1225 = vmatmul.mubr.msk.f32.gmra.mxu1 %vm145_vm0, %v260_v57  ;;  %v757_v57 = vmul.f32 0.9, %v592_v55 }
 0x396   :  { %v1181_v38 = vpop.f32.mrf.mxu0 }
 0x397   :  { %v656_v63 = vmul.f32 %v1181_v38, %v624_v39 }
 0x398   :  { %v423_v33 = vpop.f32.mrf.mxu0 }
 0x399   :  { %v720_v46 = vadd.f32 %v688_v40, %v656_v63  ;;  %v655_v47 = vmul.f32 %v623_v43, %v423_v33  ;;  %v692_v33 = vmul.f32 0.0001, %v1437_v22 }
 0x39b   :  { %v788_v49 = vadd.f32 %v756_v45, %v720_v46  ;;  %v719_v37 = vadd.f32 %v687_v13, %v655_v47 }
 0x39d   :  { %v825_v50 = vsub.f32 %v788_v49, %v591_v36  ;;  %v960_v51 = vmul.f32 %v1536_v41, %v788_v49  ;;  %v787_v52 = vadd.f32 %v755_v48, %v719_v37 }
 0x39e   :  { %v1184_v56 = vpop.f32.mrf.mxu0 }
 0x39f   :  { %v857_v61 = vmul.f32 %v1529_v6, %v825_v50  ;;  %v992_v62 = vsub.f32 %v1485_v30, %v960_v51  ;;  %v824_v0 = vsub.f32 %v787_v52, %v590_v42  ;;  %v959_v2 = vmul.f32 %v1536_v41, %v787_v52  ;;  %v627_v50 = vld [vmem:[%s2409_s6 + $0x20] sm:$0xff] }
 0x3a0   :  { %v658_v34 = vmul.f32 %v1184_v56, %v626_v44  ;;  %v433_v53 = vpop.f32.mrf.mxu0  ;;  %v691_v56 = vmul.f32 0.0001, %v1449_v24 }
 0x3a1   :  { %v889_v39 = vadd.f32 %v857_v61, %v591_v36  ;;  %1024 = vst.msk [vmem:[%s2410_s8 + $0x8] sm:$0xff] %vm145_vm0, %v992_v62  ;;  %v856_v40 = vmul.f32 %v1529_v6, %v824_v0  ;;  %v991_v38 = vsub.f32 %v1497_v32, %v959_v2  ;;  %v657_v43 = vmul.f32 %v625_v59, %v433_v53  ;;  %v628_v32 = vld [vmem:[%s2409_s6 + $0x28] sm:$0xff] }
 0x3a2   :  { %v722_v63 = vadd.f32 %v690_v58, %v658_v34 }
 0x3a3   :  { %921 = vst.msk [vmem:[%s2411_s10 + $0x8] sm:$0xff] %vm145_vm0, %v889_v39  ;;  %v888_v30 = vadd.f32 %v856_v40, %v590_v42  ;;  %1023 = vst.msk [vmem:[%s2410_s8] sm:$0xff] %vm145_vm0, %v991_v38  ;;  %v721_v36 = vadd.f32 %v689_v60, %v657_v43  ;;  %v630_v40 = vld [vmem:[%s2409_s6 + $0x38] sm:$0xff] }
 0x3a4   :  { %v790_v13 = vadd.f32 %v758_v35, %v722_v63  ;;  %v694_v63 = vmul.f32 0.0001, %v1413_v18 }
 0x3a5   :  { %v789_v42 = vadd.f32 %v757_v57, %v721_v36  ;;  %v693_v36 = vmul.f32 0.0001, %v1425_v20 }
 0x3a6   :  { %v827_v47 = vsub.f32 %v790_v13, %v593_v54  ;;  %v962_v48 = vmul.f32 %v1536_v41, %v790_v13  ;;  %v1187_v49 = vpop.f32.mrf.mxu0 }
 0x3a7   :  { %v826_v51 = vsub.f32 %v789_v42, %v592_v55  ;;  %v961_v52 = vmul.f32 %v1536_v41, %v789_v42  ;;  %v660_v44 = vmul.f32 %v1187_v49, %v628_v32 }
 0x3a8   :  { %v859_v58 = vmul.f32 %v1529_v6, %v827_v47  ;;  %v994_v59 = vsub.f32 %v1461_v26, %v962_v48  ;;  %v443_v60 = vpop.f32.mrf.mxu0 }
 0x3a9   :  { %v858_v62 = vmul.f32 %v1529_v6, %v826_v51  ;;  %v993_v0 = vsub.f32 %v1473_v28, %v961_v52  ;;  %v724_v2 = vadd.f32 %v692_v33, %v660_v44  ;;  %v659_v34 = vmul.f32 %v627_v50, %v443_v60 }
 0x3aa   :  { %v595_v45 = vld [vmem:[%s2408_s4 + $0x28] sm:$0xff]  ;;  %v891_v35 = vadd.f32 %v859_v58, %v593_v54  ;;  %1026 = vst.msk [vmem:[%s2410_s8 + $0x18] sm:$0xff] %vm145_vm0, %v994_v59  ;;  %v696_v60 = vmul.f32 0.0001, %v1388_v14 }
 0x3ab   :  { %920 = vst.msk [vmem:[%s2411_s10] sm:$0xff] %vm145_vm0, %v888_v30  ;;  %v760_v37 = vmul.f32 0.9, %v595_v45  ;;  %v890_v53 = vadd.f32 %v858_v62, %v592_v55  ;;  %1025 = vst.msk [vmem:[%s2410_s8 + $0x10] sm:$0xff] %vm145_vm0, %v993_v0  ;;  %v723_v57 = vadd.f32 %v691_v56, %v659_v34  ;;  %v629_v30 = vld [vmem:[%s2409_s6 + $0x30] sm:$0xff] }
 0x3ad   :  { %v792_v26 = vadd.f32 %v760_v37, %v724_v2 }
 0x3ae   :  { %v1190_v43 = vpop.f32.mrf.mxu1 }
 0x3af   :  { %v829_v28 = vsub.f32 %v792_v26, %v595_v45  ;;  %v964_v54 = vmul.f32 %v1536_v41, %v792_v26  ;;  %v662_v47 = vmul.f32 %v1190_v43, %v630_v40 }
 0x3b0   :  { %v453_v49 = vpop.f32.mrf.mxu1 }
 0x3b1   :  { %v861_v13 = vmul.f32 %v1529_v6, %v829_v28  ;;  %v996_v32 = vsub.f32 %v1437_v22, %v964_v54  ;;  %v661_v44 = vmul.f32 %v629_v30, %v453_v49  ;;  %v726_v56 = vadd.f32 %v694_v63, %v662_v47 }
 0x3b2   :  { %v594_v46 = vld [vmem:[%s2408_s4 + $0x20] sm:$0xff]  ;;  %v695_v28 = vmul.f32 0.0001, %v1401_v16 }
 0x3b3   :  { %v759_v61 = vmul.f32 0.9, %v594_v46  ;;  %923 = vst.msk [vmem:[%s2411_s10 + $0x18] sm:$0xff] %vm145_vm0, %v891_v35  ;;  %922 = vst.msk [vmem:[%s2411_s10 + $0x10] sm:$0xff] %vm145_vm0, %v890_v53  ;;  %v893_v50 = vadd.f32 %v861_v13, %v595_v45  ;;  %v725_v45 = vadd.f32 %v693_v36, %v661_v44  ;;  %v631_v35 = vld [vmem:[%s2409_s6 + $0x40] sm:$0xff] }
 0x3b4   :  { %1028 = vst.msk [vmem:[%s2410_s8 + $0x28] sm:$0xff] %vm145_vm0, %v996_v32 }
 0x3b5   :  { %v791_v55 = vadd.f32 %v759_v61, %v723_v57 }
 0x3b6   :  { %v1193_v2 = vpop.f32.mrf.mxu1 }
 0x3b7   :  { %v828_v42 = vsub.f32 %v791_v55, %v594_v46  ;;  %v963_v33 = vmul.f32 %v1536_v41, %v791_v55 }
 0x3b8   :  { %v463_v40 = vpop.f32.mrf.mxu1 }
 0x3b9   :  { %v860_v51 = vmul.f32 %v1529_v6, %v828_v42  ;;  %v995_v52 = vsub.f32 %v1449_v24, %v963_v33  ;;  %v632_v24 = vld [vmem:[%s2409_s6 + $0x48] sm:$0xff]  ;;  %v663_v13 = vmul.f32 %v631_v35, %v463_v40  ;;  %v699_v40 = vmul.f32 0.0001, %v1348_v7 }
 0x3ba   :  { %v597_v39 = vld [vmem:[%s2408_s4 + $0x38] sm:$0xff]  ;;  %v596_v38 = vld [vmem:[%s2408_s4 + $0x30] sm:$0xff]  ;;  %v664_v57 = vmul.f32 %v1193_v2, %v632_v24 }
 0x3bb   :  { %v762_v48 = vmul.f32 0.9, %v597_v39  ;;  %v761_v37 = vmul.f32 0.9, %v596_v38  ;;  %925 = vst.msk [vmem:[%s2411_s10 + $0x28] sm:$0xff] %vm145_vm0, %v893_v50  ;;  %v892_v22 = vadd.f32 %v860_v51, %v594_v46  ;;  %1027 = vst.msk [vmem:[%s2410_s8 + $0x20] sm:$0xff] %vm145_vm0, %v995_v52  ;;  %v727_v33 = vadd.f32 %v695_v28, %v663_v13 }
 0x3bc   :  { %v728_v36 = vadd.f32 %v696_v60, %v664_v57  ;;  %v698_v50 = vmul.f32 0.0001, %v1359_v9  ;;  %v633_v51 = vld [vmem:[%s2409_s6 + $0x50] sm:$0xff]  ;;  %v697_v52 = vmul.f32 0.0001, %v1371_v11 }
 0x3bd   :  { %v794_v59 = vadd.f32 %v762_v48, %v726_v56  ;;  %v793_v46 = vadd.f32 %v761_v37, %v725_v45  ;;  %v634_v48 = vld [vmem:[%s2409_s6 + $0x58] sm:$0xff] }
 0x3be   :  { %v1196_v37 = vpop.f32.mrf.mxu1 }
 0x3bf   :  { %v831_v62 = vsub.f32 %v794_v59, %v597_v39  ;;  %v966_v0 = vmul.f32 %v1536_v41, %v794_v59  ;;  %v830_v53 = vsub.f32 %v793_v46, %v596_v38  ;;  %v965_v26 = vmul.f32 %v1536_v41, %v793_v46 }
 0x3c0   :  { %v666_v59 = vmul.f32 %v1196_v37, %v634_v48  ;;  %v473_v46 = vpop.f32.mrf.mxu1 }
 0x3c1   :  { %v863_v54 = vmul.f32 %v1529_v6, %v831_v62  ;;  %v998_v55 = vsub.f32 %v1413_v18, %v966_v0  ;;  %v862_v63 = vmul.f32 %v1529_v6, %v830_v53  ;;  %v997_v30 = vsub.f32 %v1425_v20, %v965_v26 }
 0x3c2   :  { %v599_v58 = vld [vmem:[%s2408_s4 + $0x48] sm:$0xff]  ;;  %v700_v26 = vmul.f32 0.0001, %v1338_v5 }
 0x3c3   :  { %924 = vst.msk [vmem:[%s2411_s10 + $0x20] sm:$0xff] %vm145_vm0, %v892_v22  ;;  %v764_v34 = vmul.f32 0.9, %v599_v58  ;;  %v895_v32 = vadd.f32 %v863_v54, %v597_v39  ;;  %1030 = vst.msk [vmem:[%s2410_s8 + $0x38] sm:$0xff] %vm145_vm0, %v998_v55  ;;  %v894_v42 = vadd.f32 %v862_v63, %v596_v38  ;;  %v636_v54 = vld [vmem:[%s2409_s6 + $0x68] sm:$0xff] }
 0x3c4   :  { %1029 = vst.msk [vmem:[%s2410_s8 + $0x30] sm:$0xff] %vm145_vm0, %v997_v30  ;;  %v1805_v30 = vmul.f32 0.0001, %v1319_v1 }
 0x3c5   :  { %v796_v18 = vadd.f32 %v764_v34, %v728_v36  ;;  %v665_v34 = vmul.f32 %v633_v51, %v473_v46  ;;  %v1839_v51 = vmul.f32 0.0001, %v1491_v31 }
 0x3c7   :  { %v833_v20 = vsub.f32 %v796_v18, %v599_v58  ;;  %v968_v39 = vmul.f32 %v1536_v41, %v796_v18  ;;  %v729_v28 = vadd.f32 %v697_v52, %v665_v34  ;;  %v1875_v34 = vmul.f32 0.0001, %v1467_v27 }
 0x3c9   :  { %v865_v44 = vmul.f32 %v1529_v6, %v833_v20  ;;  %v1000_v56 = vsub.f32 %v1388_v14, %v968_v39  ;;  %v1199_v20 = vpop.f32.mrf.mxu1  ;;  %v635_v39 = vld [vmem:[%s2409_s6 + $0x60] sm:$0xff] }
 0x3ca   :  { %v598_v61 = vld [vmem:[%s2408_s4 + $0x40] sm:$0xff] }
 0x3cb   :  { %v763_v43 = vmul.f32 0.9, %v598_v61  ;;  %927 = vst.msk [vmem:[%s2411_s10 + $0x38] sm:$0xff] %vm145_vm0, %v895_v32  ;;  %926 = vst.msk [vmem:[%s2411_s10 + $0x30] sm:$0xff] %vm145_vm0, %v894_v42  ;;  %v897_v0 = vadd.f32 %v865_v44, %v599_v58  ;;  %v730_v58 = vadd.f32 %v698_v50, %v666_v59  ;;  %v1815_v32 = vmul.f32 0.0001, %v1327_v3 }
 0x3cc   :  { %1032 = vst.msk [vmem:[%s2410_s8 + $0x48] sm:$0xff] %vm145_vm0, %v1000_v56  ;;  %v1831_v3 = vmul.f32 0.0001, %v1479_v29  ;;  %v668_v50 = vmul.f32 %v1199_v20, %v636_v54  ;;  %v1852_v59 = vmul.f32 0.0001, %v1455_v25 }
 0x3cd   :  { %v795_v38 = vadd.f32 %v763_v43, %v727_v33  ;;  %v1906_v54 = vmul.f32 0.0001, %v1443_v23  ;;  %v1929_v20 = vmul.f32 0.0001, %v1407_v17 }
 0x3cf   :  { %v832_v22 = vsub.f32 %v795_v38, %v598_v61  ;;  %v967_v45 = vmul.f32 %v1536_v41, %v795_v38 }
 0x3d1   :  { %v864_v14 = vmul.f32 %v1529_v6, %v832_v22  ;;  %v999_v2 = vsub.f32 %v1401_v16, %v967_v45  ;;  %v483_v22 = vpop.f32.mrf.mxu1 }
 0x3d2   :  { %v1738_v47 = vld [vmem:[%s2408_s4 + $0x58] sm:$0xff]  ;;  %v1746_v49 = vld [vmem:[%s2408_s4 + $0x50] sm:$0xff]  ;;  %v1761_v62 = vld [vmem:[%s2408_s4 + $0x68] sm:$0xff] }
 0x3d3   :  { %v766_v24 = vmul.f32 0.9, %v1738_v47  ;;  %v765_v60 = vmul.f32 0.9, %v1746_v49  ;;  %v1772_v35 = vld [vmem:[%s2408_s4 + $0x60] sm:$0xff]  ;;  %v1777_v53 = vld [vmem:[%s2408_s4 + $0x78] sm:$0xff]  ;;  %v896_v16 = vadd.f32 %v864_v14, %v598_v61  ;;  %v667_v14 = vmul.f32 %v635_v39, %v483_v22 }
 0x3d4   :  { %v1783_v57 = vld [vmem:[%s2408_s4 + $0x70] sm:$0xff]  ;;  %1031 = vst.msk [vmem:[%s2410_s8 + $0x40] sm:$0xff] %vm145_vm0, %v999_v2  ;;  %v768_v55 = vmul.f32 0.9, %v1761_v62  ;;  %v767_v63 = vmul.f32 0.9, %v1772_v35 }
 0x3d5   :  { %929 = vst.msk [vmem:[%s2411_s10 + $0x48] sm:$0xff] %vm145_vm0, %v897_v0  ;;  %v798_v61 = vadd.f32 %v766_v24, %v730_v58  ;;  %v1808_v36 = vmul.f32 0.9, %v1777_v53  ;;  %v797_v13 = vadd.f32 %v765_v60, %v729_v28  ;;  %v1818_v42 = vmul.f32 0.9, %v1783_v57 }
 0x3d6   :  { %v732_v0 = vadd.f32 %v700_v26, %v668_v50  ;;  %v731_v26 = vadd.f32 %v699_v40, %v667_v14  ;;  %v1935_v39 = vmul.f32 0.0001, %v1419_v19  ;;  %v640_v19 = vld [vmem:[%s2409_s6 + $0x88] sm:$0xff] }
 0x3d7   :  { %v835_v18 = vsub.f32 %v798_v61, %v1738_v47  ;;  %v970_v33 = vmul.f32 %v1536_v41, %v798_v61  ;;  %v834_v48 = vsub.f32 %v797_v13, %v1746_v49  ;;  %v969_v37 = vmul.f32 %v1536_v41, %v797_v13  ;;  %v637_v13 = vld [vmem:[%s2409_s6 + $0x70] sm:$0xff] }
 0x3d8   :  { %v799_v61 = vadd.f32 %v767_v63, %v731_v26 }
 0x3d9   :  { %v867_v44 = vmul.f32 %v1529_v6, %v835_v18  ;;  %v1002_v56 = vsub.f32 %v1359_v9, %v970_v33  ;;  %v866_v46 = vmul.f32 %v1529_v6, %v834_v48  ;;  %v1001_v60 = vsub.f32 %v1371_v11, %v969_v37  ;;  %v1202_v33 = vpop.f32.mrf.mxu1 }
 0x3da   :  { %v836_v50 = vsub.f32 %v799_v61, %v1772_v35 }
 0x3db   :  { %v899_v2 = vadd.f32 %v867_v44, %v1738_v47  ;;  %1034 = vst.msk [vmem:[%s2410_s8 + $0x58] sm:$0xff] %vm145_vm0, %v1002_v56  ;;  %v898_v58 = vadd.f32 %v866_v46, %v1746_v49  ;;  %1033 = vst.msk [vmem:[%s2410_s8 + $0x50] sm:$0xff] %vm145_vm0, %v1001_v60  ;;  %v800_v47 = vadd.f32 %v768_v55, %v732_v0  ;;  %v1900_v49 = vmul.f32 0.0001, %v1431_v21  ;;  %v638_v21 = vld [vmem:[%s2409_s6 + $0x78] sm:$0xff]  ;;  %v493_v22 = vpop.f32.mrf.mxu1 }
 0x3dc   :  { %v1801_v43 = vld [vmem:[%s2408_s4 + $0x88] sm:$0xff]  ;;  %v971_v44 = vmul.f32 %v1536_v41, %v799_v61  ;;  %v670_v17 = vmul.f32 %v1202_v33, %v638_v21  ;;  %v868_v14 = vmul.f32 %v1529_v6, %v836_v50 }
 0x3dd   :  { %928 = vst.msk [vmem:[%s2411_s10 + $0x40] sm:$0xff] %vm145_vm0, %v896_v16  ;;  %v1834_v38 = vmul.f32 0.9, %v1801_v43  ;;  %v837_v55 = vsub.f32 %v800_v47, %v1761_v62  ;;  %v972_v40 = vmul.f32 %v1536_v41, %v800_v47  ;;  %v1205_v26 = vpop.f32.mrf.mxu1 }
 0x3de   :  { %v734_v47 = vadd.f32 %v1805_v30, %v670_v17  ;;  %v900_v30 = vadd.f32 %v868_v14, %v1772_v35  ;;  %v672_v61 = vmul.f32 %v1205_v26, %v640_v19  ;;  %v2007_v35 = vmul.f32 0.0001, %v1354_v8  ;;  %v642_v8 = vld [vmem:[%s2409_s6 + $0x98] sm:$0xff] }
 0x3df   :  { %v869_v48 = vmul.f32 %v1529_v6, %v837_v55  ;;  %v1004_v37 = vsub.f32 %v1338_v5, %v972_v40  ;;  %v1953_v5 = vmul.f32 0.0001, %v1377_v12  ;;  %v1980_v40 = vmul.f32 0.0001, %v1395_v15 }
 0x3e0   :  { %v802_v33 = vadd.f32 %v1808_v36, %v734_v47  ;;  %v641_v47 = vld [vmem:[%s2409_s6 + $0x90] sm:$0xff] }
 0x3e1   :  { %v901_v0 = vadd.f32 %v869_v48, %v1761_v62  ;;  %1036 = vst.msk [vmem:[%s2410_s8 + $0x68] sm:$0xff] %vm145_vm0, %v1004_v37  ;;  %v639_v62 = vld [vmem:[%s2409_s6 + $0x80] sm:$0xff]  ;;  %v503_v48 = vpop.f32.mrf.mxu1 }
 0x3e2   :  { %v671_v36 = vmul.f32 %v639_v62, %v503_v48 }
 0x3e3   :  { %v1208_v19 = vpop.f32.mrf.mxu1 }
 0x3e4   :  { %v1823_v1 = vld [vmem:[%s2408_s4 + $0x80] sm:$0xff]  ;;  %v1844_v52 = vld [vmem:[%s2408_s4 + $0x98] sm:$0xff]  ;;  %v1857_v24 = vld [vmem:[%s2408_s4 + $0x90] sm:$0xff] }
 0x3e5   :  { %v1849_v45 = vmul.f32 0.9, %v1823_v1  ;;  %v1864_v9 = vld [vmem:[%s2408_s4 + $0xa8] sm:$0xff]  ;;  %v1872_v25 = vmul.f32 0.9, %v1844_v52  ;;  %v1880_v11 = vld [vmem:[%s2408_s4 + $0xa0] sm:$0xff] }
 0x3e6   :  { %v1888_v16 = vmul.f32 0.9, %v1857_v24  ;;  %v1893_v27 = vld [vmem:[%s2408_s4 + $0xb8] sm:$0xff]  ;;  %v1903_v28 = vmul.f32 0.9, %v1864_v9 }
 0x3e7   :  { %931 = vst.msk [vmem:[%s2411_s10 + $0x58] sm:$0xff] %vm145_vm0, %v899_v2  ;;  %930 = vst.msk [vmem:[%s2411_s10 + $0x50] sm:$0xff] %vm145_vm0, %v898_v58  ;;  %v1921_v23 = vmul.f32 0.9, %v1880_v11  ;;  %v1932_v63 = vmul.f32 0.9, %v1893_v27  ;;  %v1003_v2 = vsub.f32 %v1348_v7, %v971_v44  ;;  %v669_v58 = vmul.f32 %v637_v13, %v493_v22 }
 0x3e8   :  { %v736_v44 = vadd.f32 %v1831_v3, %v672_v61  ;;  %v974_v22 = vmul.f32 %v1536_v41, %v802_v33  ;;  %v644_v61 = vld [vmem:[%s2409_s6 + $0xa8] sm:$0xff] }
 0x3e9   :  { %1035 = vst.msk [vmem:[%s2410_s8 + $0x60] sm:$0xff] %vm145_vm0, %v1003_v2  ;;  %v733_v15 = vadd.f32 %v1815_v32, %v669_v58  ;;  %v2013_v32 = vmul.f32 0.0001, %v1365_v10  ;;  %v839_v10 = vsub.f32 %v802_v33, %v1777_v53  ;;  %v735_v58 = vadd.f32 %v1839_v51, %v671_v36 }
 0x3ea   :  { %v804_v2 = vadd.f32 %v1834_v38, %v736_v44 }
 0x3eb   :  { %v801_v50 = vadd.f32 %v1818_v42, %v733_v15  ;;  %v871_v26 = vmul.f32 %v1529_v6, %v839_v10  ;;  %v513_v15 = vpop.f32.mrf.mxu1  ;;  %v803_v10 = vadd.f32 %v1849_v45, %v735_v58 }
 0x3ec   :  { %v841_v44 = vsub.f32 %v804_v2, %v1801_v43  ;;  %v976_v36 = vmul.f32 %v1536_v41, %v804_v2 }
 0x3ed   :  { %v838_v3 = vsub.f32 %v801_v50, %v1783_v57  ;;  %v973_v14 = vmul.f32 %v1536_v41, %v801_v50 }
 0x3ee   :  { %v1926_v18 = vld [vmem:[%s2408_s4 + $0xb0] sm:$0xff]  ;;  %v1944_v56 = vld [vmem:[%s2408_s4 + $0xc8] sm:$0xff]  ;;  %v1958_v60 = vld [vmem:[%s2408_s4 + $0xc0] sm:$0xff]  ;;  %v873_v45 = vmul.f32 %v1529_v6, %v841_v44 }
 0x3ef   :  { %v1950_v46 = vmul.f32 0.9, %v1926_v18  ;;  %v1970_v12 = vld [vmem:[%s2408_s4 + $0xd8] sm:$0xff]  ;;  %v1977_v55 = vmul.f32 0.9, %v1944_v56  ;;  %v1985_v7 = vld [vmem:[%s2408_s4 + $0xd0] sm:$0xff]  ;;  %v870_v33 = vmul.f32 %v1529_v6, %v838_v3  ;;  %v1211_v3 = vpop.f32.mrf.mxu1 }
 0x3f0   :  { %933 = vst.msk [vmem:[%s2411_s10 + $0x68] sm:$0xff] %vm145_vm0, %v901_v0  ;;  %v1998_v21 = vmul.f32 0.9, %v1958_v60  ;;  %v2010_v37 = vmul.f32 0.9, %v1970_v12  ;;  %v2052_v38 = vld [vmem:[%s2400_s2 + $0xe0] sm:$0xff]  ;;  %v676_v58 = vmul.f32 %v1211_v3, %v644_v61 }
 0x3f1   :  { %v2025_v17 = vmul.f32 0.9, %v1985_v7  ;;  %v2030_v0 = vmul.f32 0.0001, %v1333_v4  ;;  %v1236_v4 = vld [vmem:[%s2400_s2 + $0x78] sm:$0xff]  ;;  %v1238_v48 = vld [vmem:[%s2400_s2 + $0x70] sm:$0xff] }
 0x3f2   :  { %v1006_v62 = vsub.f32 %v1236_v4, %v974_v22  ;;  %v2055_v51 = vmul.f32 0.0001, %v2052_v38  ;;  %v1005_v50 = vsub.f32 %v1238_v48, %v973_v14  ;;  %v643_v14 = vld [vmem:[%s2409_s6 + $0xa0] sm:$0xff] }
 0x3f4   :  { %1038 = vst.msk [vmem:[%s2410_s8 + $0x78] sm:$0xff] %vm145_vm0, %v1006_v62  ;;  %1037 = vst.msk [vmem:[%s2410_s8 + $0x70] sm:$0xff] %vm145_vm0, %v1005_v50  ;;  %v523_v62 = vpop.f32.mrf.mxu1 }
 0x3f7   :  { %v2003_v13 = vld [vmem:[%s2408_s4 + $0xe8] sm:$0xff] }
 0x3f8   :  { %932 = vst.msk [vmem:[%s2411_s10 + $0x60] sm:$0xff] %vm145_vm0, %v900_v30  ;;  %v2033_v42 = vmul.f32 0.9, %v2003_v13  ;;  %v674_v30 = vmul.f32 %v1208_v19, %v642_v8  ;;  %v903_v8 = vadd.f32 %v871_v26, %v1777_v53  ;;  %v673_v19 = vmul.f32 %v641_v47, %v513_v15 }
 0x3f9   :  { %v902_v53 = vadd.f32 %v870_v33, %v1783_v57  ;;  %v840_v47 = vsub.f32 %v803_v10, %v1823_v1  ;;  %v975_v26 = vmul.f32 %v1536_v41, %v803_v10 }
 0x3fa   :  { %v738_v22 = vadd.f32 %v1852_v59, %v674_v30  ;;  %v1008_v59 = vsub.f32 %v1479_v29, %v976_v36  ;;  %v737_v4 = vadd.f32 %v1875_v34, %v673_v19  ;;  %v646_v30 = vld [vmem:[%s2409_s6 + $0xb8] sm:$0xff]  ;;  %v905_v29 = vadd.f32 %v873_v45, %v1801_v43  ;;  %v1214_v43 = vpop.f32.mrf.mxu1 }
 0x3fb   :  { %v675_v34 = vmul.f32 %v643_v14, %v523_v62  ;;  %v872_v61 = vmul.f32 %v1529_v6, %v840_v47  ;;  %v1007_v33 = vsub.f32 %v1491_v31, %v975_v26  ;;  %v645_v31 = vld [vmem:[%s2409_s6 + $0xb0] sm:$0xff]  ;;  %v647_v62 = vld [vmem:[%s2409_s6 + $0xc0] sm:$0xff] }
 0x3fc   :  { %v806_v57 = vadd.f32 %v1872_v25, %v738_v22  ;;  %1040 = vst.msk [vmem:[%s2410_s8 + $0x88] sm:$0xff] %vm145_vm0, %v1008_v59  ;;  %v740_v25 = vadd.f32 %v1900_v49, %v676_v58  ;;  %v805_v49 = vadd.f32 %v1888_v16, %v737_v4  ;;  %v648_v4 = vld [vmem:[%s2409_s6 + $0xc8] sm:$0xff] }
 0x3fd   :  { %v739_v36 = vadd.f32 %v1906_v54, %v675_v34  ;;  %v904_v10 = vadd.f32 %v872_v61, %v1823_v1  ;;  %1039 = vst.msk [vmem:[%s2410_s8 + $0x80] sm:$0xff] %vm145_vm0, %v1007_v33  ;;  %v533_v54 = vpop.f32.mrf.mxu1 }
 0x3fe   :  { %v843_v48 = vsub.f32 %v806_v57, %v1844_v52  ;;  %v978_v50 = vmul.f32 %v1536_v41, %v806_v57  ;;  %v808_v44 = vadd.f32 %v1903_v28, %v740_v25  ;;  %v842_v3 = vsub.f32 %v805_v49, %v1857_v24 }
 0x3ff   :  { %v2076_v2 = vld [vmem:[%s2408_s4 + $0xe0] sm:$0xff]  ;;  %v977_v14 = vmul.f32 %v1536_v41, %v805_v49  ;;  %v807_v58 = vadd.f32 %v1921_v23, %v739_v36  ;;  %v677_v26 = vmul.f32 %v645_v31, %v533_v54  ;;  %v1217_v57 = vpop.f32.mrf.mxu1 }
 0x400   :  { %935 = vst.msk [vmem:[%s2411_s10 + $0x78] sm:$0xff] %vm145_vm0, %v903_v8  ;;  %934 = vst.msk [vmem:[%s2411_s10 + $0x70] sm:$0xff] %vm145_vm0, %v902_v53  ;;  %v2107_v15 = vmul.f32 0.9, %v2076_v2  ;;  %v678_v8 = vmul.f32 %v1214_v43, %v646_v30  ;;  %v875_v22 = vmul.f32 %v1529_v6, %v843_v48  ;;  %v845_v53 = vsub.f32 %v808_v44, %v1864_v9  ;;  %v650_v43 = vld [vmem:[%s2409_s6 + $0xd8] sm:$0xff] }
 0x401   :  { %937 = vst.msk [vmem:[%s2411_s10 + $0x88] sm:$0xff] %vm145_vm0, %v905_v29  ;;  %v980_v45 = vmul.f32 %v1536_v41, %v808_v44  ;;  %936 = vst.msk [vmem:[%s2411_s10 + $0x80] sm:$0xff] %vm145_vm0, %v904_v10  ;;  %v844_v34 = vsub.f32 %v807_v58, %v1880_v11  ;;  %v979_v61 = vmul.f32 %v1536_v41, %v807_v58 }
 0x402   :  { %v907_v59 = vadd.f32 %v875_v22, %v1844_v52  ;;  %v742_v47 = vadd.f32 %v1929_v20, %v678_v8  ;;  %v874_v52 = vmul.f32 %v1529_v6, %v842_v3  ;;  %v877_v23 = vmul.f32 %v1529_v6, %v845_v53 }
 0x403   :  { %v741_v48 = vadd.f32 %v1935_v39, %v677_v26 }
 0x404   :  { %v1239_v16 = vld [vmem:[%s2400_s2 + $0x98] sm:$0xff]  ;;  %939 = vst.msk [vmem:[%s2411_s10 + $0x98] sm:$0xff] %vm145_vm0, %v907_v59  ;;  %v810_v33 = vadd.f32 %v1932_v63, %v742_v47  ;;  %v906_v49 = vadd.f32 %v874_v52, %v1857_v24  ;;  %v909_v44 = vadd.f32 %v877_v23, %v1864_v9  ;;  %v680_v63 = vmul.f32 %v1217_v57, %v648_v4 }
 0x405   :  { %v1010_v28 = vsub.f32 %v1239_v16, %v978_v50  ;;  %v2135_v19 = vld [vmem:[%s2400_s2 + $0xf8] sm:$0xff]  ;;  %v543_v50 = vpop.f32.mrf.mxu1  ;;  %v876_v24 = vmul.f32 %v1529_v6, %v844_v34  ;;  %v809_v16 = vadd.f32 %v1950_v46, %v741_v48 }
 0x406   :  { %v2138_v1 = vmul.f32 0.0001, %v2135_v19  ;;  %v679_v39 = vmul.f32 %v647_v62, %v543_v50  ;;  %v847_v9 = vsub.f32 %v810_v33, %v1893_v27  ;;  %v982_v10 = vmul.f32 %v1536_v41, %v810_v33  ;;  %v651_v50 = vld [vmem:[%s2409_s6 + $0xe0] sm:$0xff] }
 0x407   :  { %1042 = vst.msk [vmem:[%s2410_s8 + $0x98] sm:$0xff] %vm145_vm0, %v1010_v28  ;;  %v1220_v22 = vpop.f32.mrf.mxu1  ;;  %v744_v28 = vadd.f32 %v1953_v5, %v680_v63  ;;  %v908_v53 = vadd.f32 %v876_v24, %v1880_v11  ;;  %v846_v58 = vsub.f32 %v809_v16, %v1926_v18  ;;  %v981_v11 = vmul.f32 %v1536_v41, %v809_v16  ;;  %v654_v63 = vld [vmem:[%s2409_s6 + $0xf8] sm:$0xff] }
 0x408   :  { %v743_v54 = vadd.f32 %v1980_v40, %v679_v39  ;;  %v682_v3 = vmul.f32 %v1220_v22, %v650_v43 }
 0x409   :  { %v553_v40 = vpop.f32.mrf.mxu1  ;;  %v812_v47 = vadd.f32 %v1977_v55, %v744_v28  ;;  %v652_v55 = vld [vmem:[%s2409_s6 + $0xe8] sm:$0xff] }
 0x40a   :  { %v811_v26 = vadd.f32 %v1998_v21, %v743_v54  ;;  %v746_v4 = vadd.f32 %v2007_v35, %v682_v3  ;;  %v653_v3 = vld [vmem:[%s2409_s6 + $0xf0] sm:$0xff] }
 0x40b   :  { %v2193_v36 = vld [vmem:[%s2408_s4 + $0xf8] sm:$0xff]  ;;  %v1223_v52 = vpop.f32.mrf.mxu1  ;;  %v849_v23 = vsub.f32 %v812_v47, %v1944_v56 }
 0x40c   :  { %938 = vst.msk [vmem:[%s2411_s10 + $0x90] sm:$0xff] %vm145_vm0, %v906_v49  ;;  %941 = vst.msk [vmem:[%s2411_s10 + $0xa8] sm:$0xff] %vm145_vm0, %v909_v44  ;;  %v2225_v59 = vmul.f32 0.9, %v2193_v36  ;;  %v983_v34 = vmul.f32 %v1536_v41, %v811_v26 }
 0x40d   :  { %940 = vst.msk [vmem:[%s2411_s10 + $0xa0] sm:$0xff] %vm145_vm0, %v908_v53  ;;  %v563_v48 = vpop.f32.mrf.mxu1  ;;  %v881_v49 = vmul.f32 %v1529_v6, %v849_v23 }
 0x40e   :  { %v1241_v30 = vld [vmem:[%s2400_s2 + $0x90] sm:$0xff]  ;;  %v1242_v20 = vld [vmem:[%s2400_s2 + $0xa8] sm:$0xff]  ;;  %v683_v28 = vmul.f32 %v651_v50, %v563_v48 }
 0x40f   :  { %v1009_v29 = vsub.f32 %v1241_v30, %v977_v14  ;;  %v1012_v25 = vsub.f32 %v1242_v20, %v980_v45  ;;  %v649_v14 = vld [vmem:[%s2409_s6 + $0xd0] sm:$0xff]  ;;  %v879_v45 = vmul.f32 %v1529_v6, %v847_v9  ;;  %v878_v30 = vmul.f32 %v1529_v6, %v846_v58  ;;  %v1226_v9 = vpop.f32.mrf.mxu1 }
 0x410   :  { %v681_v62 = vmul.f32 %v649_v14, %v553_v40  ;;  %v984_v20 = vmul.f32 %v1536_v41, %v812_v47  ;;  %v686_v53 = vmul.f32 %v1226_v9, %v654_v63  ;;  %v747_v40 = vadd.f32 %v2055_v51, %v683_v28 }
 0x411   :  { %1041 = vst.msk [vmem:[%s2410_s8 + $0x90] sm:$0xff] %vm145_vm0, %v1009_v29  ;;  %1044 = vst.msk [vmem:[%s2410_s8 + $0xa8] sm:$0xff] %vm145_vm0, %v1012_v25  ;;  %v911_v57 = vadd.f32 %v879_v45, %v1893_v27  ;;  %v848_v25 = vsub.f32 %v811_v26, %v1958_v60  ;;  %v910_v43 = vadd.f32 %v878_v30, %v1926_v18  ;;  %v573_v45 = vpop.f32.mrf.mxu1 }
 0x412   :  { %v745_v33 = vadd.f32 %v2013_v32, %v681_v62  ;;  %v684_v32 = vmul.f32 %v1223_v52, %v652_v55  ;;  %v685_v47 = vmul.f32 %v653_v3, %v573_v45 }
 0x413   :  { %943 = vst.msk [vmem:[%s2411_s10 + $0xb8] sm:$0xff] %vm145_vm0, %v911_v57  ;;  %v880_v39 = vmul.f32 %v1529_v6, %v848_v25  ;;  %942 = vst.msk [vmem:[%s2411_s10 + $0xb0] sm:$0xff] %vm145_vm0, %v910_v43 }
 0x414   :  { %v813_v22 = vadd.f32 %v2025_v17, %v745_v33  ;;  %v748_v16 = vadd.f32 %v2030_v0, %v684_v32 }
 0x418   :  { %v1243_v8 = vld [vmem:[%s2400_s2 + $0xa0] sm:$0xff] }
 0x419   :  { %v1011_v31 = vsub.f32 %v1243_v8, %v979_v61  ;;  %v814_v61 = vadd.f32 %v2010_v37, %v746_v4 }
 0x41a   :  { %v620_v54 = vld [vmem:[%s2408_s4 + $0xf0] sm:$0xff] }
 0x41b   :  { %1043 = vst.msk [vmem:[%s2410_s8 + $0xa0] sm:$0xff] %vm145_vm0, %v1011_v31  ;;  %v851_v8 = vsub.f32 %v814_v61, %v1970_v12  ;;  %v986_v31 = vmul.f32 %v1536_v41, %v814_v61  ;;  %v785_v26 = vmul.f32 0.9, %v620_v54 }
 0x41d   :  { %v883_v17 = vmul.f32 %v1529_v6, %v851_v8 }
 0x41f   :  { %v915_v58 = vadd.f32 %v883_v17, %v1970_v12 }
 0x421   :  { %947 = vst.msk [vmem:[%s2411_s10 + $0xd8] sm:$0xff] %vm145_vm0, %v915_v58 }
 0x422   :  { %v1244_v46 = vld [vmem:[%s2400_s2 + $0xb8] sm:$0xff] }
 0x423   :  { %v1014_v5 = vsub.f32 %v1244_v46, %v982_v10  ;;  %v913_v10 = vadd.f32 %v881_v49, %v1944_v56  ;;  %v912_v56 = vadd.f32 %v880_v39, %v1958_v60  ;;  %v850_v60 = vsub.f32 %v813_v22, %v1985_v7 }
 0x424   :  { %v985_v46 = vmul.f32 %v1536_v41, %v813_v22 }
 0x425   :  { %1046 = vst.msk [vmem:[%s2410_s8 + $0xb8] sm:$0xff] %vm145_vm0, %v1014_v5  ;;  %945 = vst.msk [vmem:[%s2411_s10 + $0xc8] sm:$0xff] %vm145_vm0, %v913_v10  ;;  %v816_v5 = vadd.f32 %v2033_v42, %v748_v16  ;;  %v882_v42 = vmul.f32 %v1529_v6, %v850_v60 }
 0x426   :  { %944 = vst.msk [vmem:[%s2411_s10 + $0xc0] sm:$0xff] %vm145_vm0, %v912_v56 }
 0x427   :  { %v853_v4 = vsub.f32 %v816_v5, %v2003_v13  ;;  %v988_v12 = vmul.f32 %v1536_v41, %v816_v5  ;;  %v914_v55 = vadd.f32 %v882_v42, %v1985_v7 }
 0x429   :  { %v885_v30 = vmul.f32 %v1529_v6, %v853_v4  ;;  %946 = vst.msk [vmem:[%s2411_s10 + $0xd0] sm:$0xff] %vm145_vm0, %v914_v55 }
 0x42c   :  { %v2247_v21 = vld [vmem:[%s2400_s2 + $0xf0] sm:$0xff] }
 0x42d   :  { %v717_v27 = vmul.f32 0.0001, %v2247_v21  ;;  %v1246_v29 = vld [vmem:[%s2400_s2 + $0xb0] sm:$0xff] }
 0x42e   :  { %v1013_v35 = vsub.f32 %v1246_v29, %v981_v11  ;;  %v750_v11 = vadd.f32 %v2138_v1, %v686_v53  ;;  %v815_v1 = vadd.f32 %v2107_v15, %v747_v40 }
 0x42f   :  { %v749_v52 = vadd.f32 %v717_v27, %v685_v47  ;;  %v917_v27 = vadd.f32 %v885_v30, %v2003_v13 }
 0x430   :  { %1045 = vst.msk [vmem:[%s2410_s8 + $0xb0] sm:$0xff] %vm145_vm0, %v1013_v35  ;;  %v818_v62 = vadd.f32 %v2225_v59, %v750_v11  ;;  %v852_v23 = vsub.f32 %v815_v1, %v2076_v2  ;;  %v987_v15 = vmul.f32 %v1536_v41, %v815_v1 }
 0x431   :  { %949 = vst.msk [vmem:[%s2411_s10 + $0xe8] sm:$0xff] %vm145_vm0, %v917_v27 }
 0x432   :  { %v855_v59 = vsub.f32 %v818_v62, %v2193_v36  ;;  %v990_v7 = vmul.f32 %v1536_v41, %v818_v62  ;;  %v884_v25 = vmul.f32 %v1529_v6, %v852_v23 }
 0x434   :  { %v887_v61 = vmul.f32 %v1529_v6, %v855_v59  ;;  %v1022_v33 = vsub.f32 %v2135_v19, %v990_v7  ;;  %v916_v50 = vadd.f32 %v884_v25, %v2076_v2 }
 0x436   :  { %948 = vst.msk [vmem:[%s2411_s10 + $0xe0] sm:$0xff] %vm145_vm0, %v916_v50 }
 0x437   :  { %v1247_v37 = vld [vmem:[%s2400_s2 + $0xc8] sm:$0xff]  ;;  %v1248_v18 = vld [vmem:[%s2400_s2 + $0xc0] sm:$0xff] }
 0x438   :  { %v1016_v44 = vsub.f32 %v1247_v37, %v984_v20  ;;  %v1015_v24 = vsub.f32 %v1248_v18, %v983_v34  ;;  %v817_v20 = vadd.f32 %v785_v26, %v749_v52  ;;  %v1019_v34 = vsub.f32 %v2052_v38, %v987_v15 }
 0x439   :  { %v919_v38 = vadd.f32 %v887_v61, %v2193_v36 }
 0x43a   :  { %1048 = vst.msk [vmem:[%s2410_s8 + $0xc8] sm:$0xff] %vm145_vm0, %v1016_v44  ;;  %1047 = vst.msk [vmem:[%s2410_s8 + $0xc0] sm:$0xff] %vm145_vm0, %v1015_v24  ;;  %v854_v13 = vsub.f32 %v817_v20, %v620_v54  ;;  %v989_v48 = vmul.f32 %v1536_v41, %v817_v20 }
 0x43b   :  { %951 = vst.msk [vmem:[%s2411_s10 + $0xf8] sm:$0xff] %vm145_vm0, %v919_v38 }
 0x43c   :  { %v886_v19 = vmul.f32 %v1529_v6, %v854_v13  ;;  %v1021_v43 = vsub.f32 %v2247_v21, %v989_v48 }
 0x43e   :  { %v918_v41 = vadd.f32 %v886_v19, %v620_v54 }
 0x440   :  { %950 = vst.msk [vmem:[%s2411_s10 + $0xf0] sm:$0xff] %vm145_vm0, %v918_v41 }
 0x441   :  { %v1249_v0 = vld [vmem:[%s2400_s2 + $0xd8] sm:$0xff] }
 0x442   :  { %v1018_v14 = vsub.f32 %v1249_v0, %v986_v31 }
 0x444   :  { %1050 = vst.msk [vmem:[%s2410_s8 + $0xd8] sm:$0xff] %vm145_vm0, %v1018_v14 }
 0x44b   :  { %v1250_v51 = vld [vmem:[%s2400_s2 + $0xd0] sm:$0xff] }
 0x44c   :  { %v1017_v57 = vsub.f32 %v1250_v51, %v985_v46 }
 0x44e   :  { %1049 = vst.msk [vmem:[%s2410_s8 + $0xd0] sm:$0xff] %vm145_vm0, %v1017_v57 }
 0x455   :  { %v1251_v29 = vld [vmem:[%s2400_s2 + $0xe8] sm:$0xff] }
 0x456   :  { %v1020_v35 = vsub.f32 %v1251_v29, %v988_v12  ;;  %1051 = vst.msk [vmem:[%s2410_s8 + $0xe0] sm:$0xff] %vm145_vm0, %v1019_v34  ;;  %1054 = vst.msk [vmem:[%s2410_s8 + $0xf8] sm:$0xff] %vm145_vm0, %v1022_v33 }
 0x457   :  { %1053 = vst.msk [vmem:[%s2410_s8 + $0xf0] sm:$0xff] %vm145_vm0, %v1021_v43 }
 0x458   :  { %1052 = vst.msk [vmem:[%s2410_s8 + $0xe8] sm:$0xff] %vm145_vm0, %v1020_v35 }

</bundles_post_ra>
